<compile_context>
chip_gen: v7x
topology: tpu7x:2x2x1
jax: 0.10.0
libtpu: 0.0.40
codegen_flags: <defaults>
</compile_context>

<pallas_src>
import jax
import jax.numpy as jnp
from jax.experimental import pallas as pl
from jax.experimental.pallas import tpu as pltpu


# --------------------------- helpers -----------------------------------------

def _pick_class_block(n_cls, per_class_bytes, budget_bytes):
    c_blk = max(1, min(n_cls, budget_bytes // max(per_class_bytes, 1)))
    # v7x has 2 TensorCores: make sure the "parallel" class axis has >= 2 steps.
    if n_cls > 1 and pl.cdiv(n_cls, c_blk) < 2:
        c_blk = pl.cdiv(n_cls, 2)
    return int(c_blk)


# ------------------ variant 1: batched dense concat --------------------------

def _concat_kernel(prefix_ref, ctx_ref, suffix_ref, out_ref):
    c_blk = out_ref.shape[0]
    # Cast in vregs (ctx param may be fp32 while CLIP buffers are fp16/bf16):
    # cheaper than a wrapper-side cast that would round-trip HBM.
    ctx = ctx_ref[...].astype(out_ref.dtype)
    if ctx.shape[0] != c_blk:            # generic context block (1, n_ctx, D)
        ctx = jnp.broadcast_to(ctx, (c_blk,) + ctx.shape[1:])
    # Single dense store per tile: the sublane shuffles of the concat go to the
    # XLU; the store path stays unmasked / full-tile.
    out_ref[...] = jnp.concatenate([prefix_ref[...], ctx, suffix_ref[...]], axis=1)


def prompt_learner_forward(ctx, token_prefix, token_suffix,
                           class_token_position="end", class_block=None):
    """Pallas implementation of PromptLearner.forward() (class_token_position='end').

    ctx:          (n_ctx, D) generic  or  (n_cls, n_ctx, D) class-specific (CSC)
    token_prefix: (n_cls, 1, D)        (SOS embedding, constant buffer)
    token_suffix: (n_cls, L-1-n_ctx, D) (class tokens + EOS + padding, constant)
    returns prompts: (n_cls, L, D) in token_prefix.dtype (ctx cast in-kernel).
    """
    if class_token_position != "end":
        # TODO(synk): "middle"/"front" need per-class name_lens-dependent ragged
        # concat (dynamic sublane gather); not implemented as a kernel.
        raise NotImplementedError("only class_token_position='end' is implemented")

    n_cls, _, d = token_prefix.shape
    dtype = token_prefix.dtype            # CLIP dtype; ctx cast to it in-kernel.
    l_suf = token_suffix.shape[1]
    assert l_suf > 0, "token_suffix must contain at least the EOS embedding"

    if ctx.ndim == 2:                      # generic context, broadcast over classes
        n_ctx = ctx.shape[0]
        ctx3 = ctx.reshape(1, n_ctx, d)
        csc = False
    else:                                  # class-specific context
        n_ctx = ctx.shape[1]
        ctx3 = ctx
        csc = True

    seq_len = 1 + n_ctx + l_suf
    itemsize = jnp.dtype(dtype).itemsize

    if class_block is None:
        # rows touched per class (inputs + output), x2 for double buffering;
        # keep under ~24 MiB so the same choice also fits v7x's 64 MiB VMEM.
        rows = 1 + l_suf + seq_len + (n_ctx if csc else 0)
        per_class = 2 * rows * d * itemsize
        class_block = _pick_class_block(n_cls, per_class, 24 * 1024 * 1024)
    c_blk = int(class_block)
    n_blocks = pl.cdiv(n_cls, c_blk)       # remainder blocks handled by Pallas

    ctx_spec = (pl.BlockSpec((c_blk, n_ctx, d), lambda i: (i, 0, 0)) if csc
                else pl.BlockSpec((1, n_ctx, d), lambda i: (0, 0, 0)))

    bytes_accessed = ((token_prefix.size + token_suffix.size
                       + n_cls * seq_len * d) * itemsize
                      + ctx3.size * jnp.dtype(ctx3.dtype).itemsize)

    return pl.pallas_call(
        _concat_kernel,
        out_shape=jax.ShapeDtypeStruct((n_cls, seq_len, d), dtype),
        grid=(n_blocks,),
        in_specs=[
            pl.BlockSpec((c_blk, 1, d), lambda i: (i, 0, 0)),      # prefix
            ctx_spec,                                              # ctx
            pl.BlockSpec((c_blk, l_suf, d), lambda i: (i, 0, 0)),  # suffix
        ],
        out_specs=pl.BlockSpec((c_blk, seq_len, d), lambda i: (i, 0, 0)),
        compiler_params=pltpu.CompilerParams(
            dimension_semantics=("parallel",),
            vmem_limit_bytes=32 * 1024 * 1024),
        cost_estimate=pl.CostEstimate(flops=0, transcendentals=0,
                                      bytes_accessed=int(bytes_accessed)),
    )(token_prefix, ctx3, token_suffix)


# ------------- variant 2: aliased template, write only the ctx head ----------

def make_prompt_template(token_prefix, token_suffix, n_ctx):
    """Constant (prefix | zeros | suffix) prompt tensor; compute once at init."""
    n_cls, _, d = token_prefix.shape
    zeros = jnp.zeros((n_cls, n_ctx, d), dtype=token_prefix.dtype)
    return jnp.concatenate([token_prefix, zeros, token_suffix], axis=1)


def _make_scatter_kernel(c_blk, n_blocks, rem, head_rows):
    """Writes only the (prefix | ctx) head rows of the aliased output.  Rows
    >= head_rows are already correct: they ARE the template's suffix.  The
    out-DMA is double-buffered across grid steps (drained two steps later, or
    in the last-step epilogue) so it overlaps the next step's input DMAs and
    vreg assembly instead of start();wait() per step."""

    def kernel(prefix_ref, ctx_ref, template_ref, out_ref, head_scratch, sems):
        del template_ref        # same HBM buffer as out_ref (input_output_aliases)
        i = pl.program_id(0)
        slot = i % 2

        def wait_copy(slot_idx, n_classes):
            # Only the transfer shape matters for the wait (sem decrement).
            pltpu.make_async_copy(
                head_scratch.at[slot_idx, pl.ds(0, n_classes)],
                out_ref.at[pl.ds(0, n_classes), :head_rows, :],
                sems.at[slot_idx]).wait()

        def start_copy(n_classes):
            pltpu.make_async_copy(
                head_scratch.at[slot, pl.ds(0, n_classes)],
                out_ref.at[pl.ds(i * c_blk, n_classes), :head_rows, :],
                sems.at[slot]).start()

        # Before overwriting this slot, drain the copy issued two steps ago
        # (that copy was never the remainder block, so its size is c_blk).
        @pl.when(i >= 2)
        def _():
            wait_copy(slot, c_blk)

        # Assemble (prefix | ctx) head rows in VMEM for this slot.
        ctx = ctx_ref[...].astype(head_scratch.dtype)
        if ctx.shape[0] != c_blk:          # generic context block (1, n_ctx, D)
            ctx = jnp.broadcast_to(ctx, (c_blk,) + ctx.shape[1:])
        head_scratch[slot] = jnp.concatenate([prefix_ref[...], ctx], axis=1)

        if rem == c_blk:                   # class block divides n_cls
            start_copy(c_blk)
        else:
            @pl.when(i < n_blocks - 1)
            def _():
                start_copy(c_blk)

            @pl.when(i == n_blocks - 1)
            def _():
                start_copy(rem)

        # Last-step epilogue: drain everything still in flight.
        @pl.when(i == n_blocks - 1)
        def _():
            if n_blocks >= 2:
                wait_copy(1 - slot, c_blk)   # previous step's copy
            wait_copy(slot, rem)             # this step's copy

    return kernel


def prompt_learner_forward_aliased(ctx, token_prefix, template, class_block=None):
    """Forward that only writes the (prefix + ctx) head rows of an aliased
    precomputed template (see make_prompt_template).  `template` is consumed by
    aliasing; donate it (e.g. jax.jit donate_argnums) so XLA does not insert a
    defensive copy and the ~L/(1+n_ctx)x HBM-traffic saving is realized."""
    n_cls, seq_len, d = template.shape
    dtype = template.dtype
    if ctx.ndim == 2:
        n_ctx = ctx.shape[0]
        ctx3 = ctx.reshape(1, n_ctx, d)
        csc = False
    else:
        n_ctx = ctx.shape[1]
        ctx3 = ctx
        csc = True
    head_rows = 1 + n_ctx
    itemsize = jnp.dtype(dtype).itemsize

    if class_block is None:
        # prefix+ctx input pipeline (x2) + 2-slot head scratch, per class.
        rows = 2 * (1 + (n_ctx if csc else 0)) + 2 * head_rows
        per_class = rows * d * itemsize
        class_block = _pick_class_block(n_cls, per_class, 8 * 1024 * 1024)
    c_blk = int(class_block)
    n_blocks = pl.cdiv(n_cls, c_blk)
    rem = n_cls - (n_blocks - 1) * c_blk

    ctx_spec = (pl.BlockSpec((c_blk, n_ctx, d), lambda i: (i, 0, 0)) if csc
                else pl.BlockSpec((1, n_ctx, d), lambda i: (0, 0, 0)))

    bytes_accessed = (n_cls * (1 + head_rows) * d * itemsize
                      + ctx3.size * jnp.dtype(ctx3.dtype).itemsize)

    return pl.pallas_call(
        _make_scatter_kernel(c_blk, n_blocks, rem, head_rows),
        out_shape=jax.ShapeDtypeStruct((n_cls, seq_len, d), dtype),
        grid=(n_blocks,),
        in_specs=[
            pl.BlockSpec((c_blk, 1, d), lambda i: (i, 0, 0)),   # prefix
            ctx_spec,                                           # ctx
            pl.BlockSpec(memory_space=pl.ANY),                  # template (aliased)
        ],
        out_specs=pl.BlockSpec(memory_space=pl.ANY),
        scratch_shapes=[pltpu.VMEM((2, c_blk, head_rows, d), dtype),
                        pltpu.SemaphoreType.DMA((2,))],
        input_output_aliases={2: 0},
        compiler_params=pltpu.CompilerParams(
            # "arbitrary": the double-buffered out-DMA carries state across grid
            # steps, so the class axis must stay sequential on one core.
            dimension_semantics=("arbitrary",),
            vmem_limit_bytes=32 * 1024 * 1024),
        cost_estimate=pl.CostEstimate(flops=0, transcendentals=0,
                                      bytes_accessed=int(bytes_accessed)),
    )(token_prefix, ctx3, template)


# ------------------------------ demo ------------------------------------------

if __name__ == "__main__":
    # Small CoOp-like shapes (CLIP would be L=77, D=512, fp16): bf16 like CLIP's
    # half precision — halves HBM bytes on this purely bandwidth-bound op.
    n_cls, n_ctx, seq_len, d = 10, 4, 16, 128
    dtype = jnp.bfloat16

    key = jax.random.PRNGKey(0)
    k_emb, k_ctx, k_csc = jax.random.split(key, 3)

    # Stand-in for clip_model.token_embedding(tokenized_prompts).
    embedding = jax.random.normal(k_emb, (n_cls, seq_len, d),
                                  dtype=jnp.float32).astype(dtype)
    token_prefix = embedding[:, :1, :]               # SOS
    token_suffix = embedding[:, 1 + n_ctx:, :]       # class tokens + EOS + padding

    # Learnable contexts (nn.init.normal_(std=0.02)).
    ctx = (0.02 * jax.random.normal(k_ctx, (n_ctx, d),
                                    dtype=jnp.float32)).astype(dtype)
    ctx_csc = (0.02 * jax.random.normal(k_csc, (n_cls, n_ctx, d),
                                        dtype=jnp.float32)).astype(dtype)

    # Pure-JAX references.
    ref_generic = jnp.concatenate(
        [token_prefix, jnp.broadcast_to(ctx[None], (n_cls, n_ctx, d)),
         token_suffix], axis=1)
    ref_csc = jnp.concatenate([token_prefix, ctx_csc, token_suffix], axis=1)

    # 1) Batched dense-concat kernel, generic ctx, auto class block.
    out1 = jax.block_until_ready(
        prompt_learner_forward(ctx, token_prefix, token_suffix))
    assert out1.shape == (n_cls, seq_len, d) and out1.dtype == dtype
    assert jnp.array_equal(out1, ref_generic), "generic-ctx mismatch"

    # 1b) fp32 learnable ctx cast in-kernel (bf16 round-trip is exact here).
    out1b = jax.block_until_ready(
        prompt_learner_forward(ctx.astype(jnp.float32), token_prefix, token_suffix))
    assert out1b.dtype == dtype
    assert jnp.array_equal(out1b, ref_generic), "fp32-ctx cast mismatch"

    # 1c) Same kernel, class-specific ctx, non-divisible class block (remainder).
    out2 = jax.block_until_ready(
        prompt_learner_forward(ctx_csc, token_prefix, token_suffix, class_block=4))
    assert jnp.array_equal(out2, ref_csc), "class-specific-ctx mismatch"

    # 2) Aliased-template kernel: only (prefix + ctx) head rows are written.
    template_a = make_prompt_template(token_prefix, token_suffix, n_ctx)
    out3 = jax.block_until_ready(
        prompt_learner_forward_aliased(ctx, token_prefix, template_a, class_block=4))
    assert out3.shape == (n_cls, seq_len, d) and out3.dtype == dtype
    assert jnp.array_equal(out3, ref_generic), "aliased-template mismatch"

    # 2b) Aliased kernel, class-specific ctx, 4 grid steps with remainder=1
    #     (exercises the double-buffered out-DMA drain path).
    template_b = make_prompt_template(token_prefix, token_suffix, n_ctx)
    out4 = jax.block_until_ready(
        prompt_learner_forward_aliased(ctx_csc, token_prefix, template_b,
                                       class_block=3))
    assert jnp.array_equal(out4, ref_csc), "aliased-template CSC mismatch"

    print("KERNEL_OK")
</pallas_src>

<mosaic_0001>
module attributes {stable_mosaic.version = 11 : i64} {
  func.func @_concat_kernel(%arg0: i32, %arg1: memref<5x1x128xbf16, #tpu.memory_space<vmem>>, %arg2: memref<1x4x128xbf16, #tpu.memory_space<vmem>>, %arg3: memref<5x11x128xbf16, #tpu.memory_space<vmem>>, %arg4: memref<5x16x128xbf16, #tpu.memory_space<vmem>>) attributes {dimension_semantics = [#tpu.dimension_semantics<parallel>], iteration_bounds = array<i64: 2>, scalar_prefetch = 0 : i64, scratch_operands = 0 : i64, tpu.core_type = #tpu.core_type<tc>, window_params = [{transform_indices = @transform_0, window_bounds = array<i64: 5, 1, 128>}, {pipeline_mode = #tpu.pipeline_mode<synchronous>, transform_indices = @transform_1, window_bounds = array<i64: 1, 4, 128>}, {transform_indices = @transform_2, window_bounds = array<i64: 5, 11, 128>}, {transform_indices = @transform_3, window_bounds = array<i64: 5, 16, 128>}]} {
    %c0 = arith.constant 0 : index
    %c0_0 = arith.constant 0 : index
    %c0_1 = arith.constant 0 : index
    %0 = vector.load %arg2[%c0, %c0_0, %c0_1] : memref<1x4x128xbf16, #tpu.memory_space<vmem>>, vector<1x4x128xbf16>
    %1 = vector.shape_cast %0 : vector<1x4x128xbf16> to vector<1x4x128xbf16>
    %2 = vector.broadcast %1 : vector<1x4x128xbf16> to vector<5x4x128xbf16>
    %c0_2 = arith.constant 0 : index
    %c0_3 = arith.constant 0 : index
    %c0_4 = arith.constant 0 : index
    %3 = vector.load %arg1[%c0_2, %c0_3, %c0_4] : memref<5x1x128xbf16, #tpu.memory_space<vmem>>, vector<5x1x128xbf16>
    %c0_5 = arith.constant 0 : index
    %c0_6 = arith.constant 0 : index
    %c0_7 = arith.constant 0 : index
    %4 = vector.load %arg3[%c0_5, %c0_6, %c0_7] : memref<5x11x128xbf16, #tpu.memory_space<vmem>>, vector<5x11x128xbf16>
    %5 = tpu.concatenate %3, %2, %4 in 1 : vector<5x1x128xbf16>, vector<5x4x128xbf16>, vector<5x11x128xbf16> -> vector<5x16x128xbf16>
    %c0_8 = arith.constant 0 : index
    %c0_9 = arith.constant 0 : index
    %c0_10 = arith.constant 0 : index
    %6 = vector.load %arg4[%c0_8, %c0_9, %c0_10] : memref<5x16x128xbf16, #tpu.memory_space<vmem>>, vector<5x16x128xbf16>
    tpu.vector_store %arg4[%c0_8, %c0_9, %c0_10], %5 {strides = array<i32>} : memref<5x16x128xbf16, #tpu.memory_space<vmem>>, vector<5x16x128xbf16>,
    return
  }
  func.func @transform_0(%arg0: i32) -> (i32, i32, i32) {
    %c0_i32 = arith.constant 0 : i32
    %c0_i32_0 = arith.constant 0 : i32
    %c0_i32_1 = arith.constant 0 : i32
    return %arg0, %c0_i32, %c0_i32_0 : i32, i32, i32
  }
  func.func @transform_1(%arg0: i32) -> (i32, i32, i32) {
    %c0_i32 = arith.constant 0 : i32
    %c0_i32_0 = arith.constant 0 : i32
    %c0_i32_1 = arith.constant 0 : i32
    %c0_i32_2 = arith.constant 0 : i32
    return %c0_i32, %c0_i32_0, %c0_i32_1 : i32, i32, i32
  }
  func.func @transform_2(%arg0: i32) -> (i32, i32, i32) {
    %c0_i32 = arith.constant 0 : i32
    %c0_i32_0 = arith.constant 0 : i32
    %c0_i32_1 = arith.constant 0 : i32
    return %arg0, %c0_i32, %c0_i32_0 : i32, i32, i32
  }
  func.func @transform_3(%arg0: i32) -> (i32, i32, i32) {
    %c0_i32 = arith.constant 0 : i32
    %c0_i32_0 = arith.constant 0 : i32
    %c0_i32_1 = arith.constant 0 : i32
    return %arg0, %c0_i32, %c0_i32_0 : i32, i32, i32
  }
}

</mosaic_0001>

<bundles_post_ra>
// kernel: tpu_custom_call.1
= control target key start
LH: loop header
LB: loop body
LE: loop exit
PB: predicated region body
PF: predicated region fallthrough
CT: control target
= control target key end

     0   :  { %8 = vsyncpa [#allocation3], 0  ;;  %s907_s0 = inlined_call_operand.vmem [shape: bf16[10,1,128], index: 0, kind: input, shape index: {}]   ;;  %s908_s1 = inlined_call_operand.vmem [shape: bf16[1,4,128], index: 1, kind: input, shape index: {}]   ;;  %s909_s2 = inlined_call_operand.hbm [shape: bf16[10,11,128], index: 2, kind: input, shape index: {}]   ;;  %s910_s3 = inlined_call_operand.hbm [shape: bf16[10,16,128], index: 3, kind: output, shape index: {}]  }
   0x1   :  { %10 = vsyncpa [#allocation3 + $0x1], 0 }
   0x2   :  { %11 = vsyncpa [#allocation4], 0 }
   0x3   :  { %13 = vsyncpa [#allocation4 + $0x1], 0  ;;  %s684_s12 = smov 0   ;;  %s686_s13 = smov 0  }
   0x4   :  { %s688_s14 = smov 0   ;;  %s690_s15 = smov 0  }
   0x5 LB: > { %s705_s16 = sadd.s32 4294967295, %s656_s15   ;;  %s471_s17 = sadd.s32 4294967294, %s656_s15   ;;  %s656_s15 = sphi %s690_s15, %s926_s15   ;;  %s652_s14 = sphi %s688_s14, %s925_s14   ;;  %s648_s13 = sphi %s686_s13, %s924_s13   ;;  %s644_s12 = sphi %s684_s12, %s923_s12  }
   0x6   : > { %s709_s18 = sadd.s32 1, %s656_s15   ;;  %s73_s19 = sadd.s32 1, %s652_s14 }
   0x7   : > { %s70_s20 = ssub.s32 %s656_s15, %s709_s18  ;;  %p80_p0 = scmp.ne.s32.totalorder %s652_s14, %s648_s13 }
   0x8   : > { %p71_p1 = scmp.eq.s32.totalorder %s70_s20, 0  ;;  %p81_p2 = scmp.eq.s32.totalorder %s656_s15, 0 }
   0x9   : > { %p86_p3 = scmp.ne.s32.totalorder %s648_s13, %s644_s12  ;;  %p87_p4 = scmp.eq.s32.totalorder %s705_s16, 0 }
   0xa   : > { %s721_s21 = scalar_select %p71_p1, %s652_s14, %s73_s19  }
   0xb   : > { %p82_p5 = por %p81_p2, %p80_p0  ;;  %p723_p6 = por %p87_p4, %p86_p3 }
   0xc   : > { %p110_p7 = scmp.eq.s32.totalorder %s705_s16, 1  ;;  %p116_p8 = scmp.eq.s32.totalorder %s471_s17, 1 }
   0xd   : > { %p517_p10 = scmp.lt.s32.totalorder %s656_s15, 2  ;;  %s147_s25 = sand.u32 1, %s652_s14  }
   0xe   : > { %p730_p11 = por %p110_p7, %p80_p0  ;;  %p734_p12 = por %p116_p8, %p86_p3 }
   0xf   : > { %s501_s26 = smul.u32 640, %s656_s15  ;;  %p745_p13 = pnand %p517_p10, %p82_p5 }
  0x10   : > { %s913_s23 = scalar_select %p730_p11, 1, 0 }
  0x11   : > { %s914_s24 = scalar_select %p734_p12, 1, 0 }
  0x12   : > { %s503_s27 = smul.u32 40, %s147_s25  ;;  %s743_s30 = scalar_lea.hbm %s909_s2, %s501_s26 }
  0x13   : > { %s751_s7 = scalar_lea.sflag [#allocation3], %s147_s25  ;;  %s560_s8 = scalar_lea.hbm %s743_s30, 640 }
  0x14   : > { %s151_s5 = scalar_lea.vmem [#allocation2], %s503_s27  ;;  %p561_p0 = scmp.ne.s32.totalorder %s743_s30, %s560_s8 }
  0x15   : > { %s159_s6 = sshll.u32 %s151_s5, 4  ;;  %p562_p1 = pneg %p745_p13  ;;  %s749_s6 = int_to_ptr.vmem [resolvable:$true] %s159_s6 }
  0x16   : > { %s565_s11 = scalar_lea.hbm %s909_s2, 1280  ;;  %p566_p4 = scmp.lt.u32.totalorder %s743_s30, %s909_s2 }
  0x17   : > { %p563_p2 = pnand %p562_p1, %p561_p0  ;;  %p567_p5 = scmp.lt.u32.totalorder %s565_s11, %s560_s8 }
  0x18   : > { %p569_p8 = scmp.lt.u32.totalorder %s560_s8, %s743_s30 }
  0x19   : > { %p564_p3 = pneg %p563_p2  ;;  %p568_p7 = por %p567_p5, %p566_p4 }
  0x1b   : > { %p570_p10 = por %p569_p8, %p568_p7 }
  0x1d   : > { %p571_p9 = pnand %p570_p10, %p564_p3 }
  0x1f   : > { %574 = shalt.err (!%p571_p9)
}
  0x20   : > { %s575_s20 = scalar_lea.vmem %s749_s6, 640  ;;  %s658_s25 = smov [#allocation2]  }
  0x21   : > { %p576_p0 = scmp.ne.s32.totalorder %s749_s6, %s575_s20  ;;  %s580_s26 = sshll.u32 %s658_s25, 4  ;;  %s581_s26 = int_to_ptr.vmem [resolvable:$false] %s580_s26 }
  0x22   : > { %s582_s27 = scalar_lea.vmem %s581_s26, 1280  ;;  %p583_p11 = scmp.lt.s32.totalorder %s749_s6, %s581_s26 }
  0x23   : > { %p578_p2 = pnand %p576_p0, %p562_p1  ;;  %p584_p4 = scmp.lt.s32.totalorder %s582_s27, %s575_s20 }
  0x25   : > { %p579_p12 = pneg %p578_p2  ;;  %p585_p5 = por %p584_p4, %p583_p11 }
  0x27   : > { %p586_p7 = pnand %p585_p5, %p579_p12 }
  0x29   : > { %589 = shalt.err (!%p586_p7)
}
  0x2a   : > { %s659_s28 = smov 64   ;;  %s660_s29 = smov 4  }
  0x2b   : > { %512 = dma.hbm_to_vmem [thread:$0]  (!%p745_p13), %s743_s30, 640, %s749_s6, %s751_s7, %s659_s28, %s659_s28, %s660_s29  }
  0x2c   : > { %p476_p9 = scmp.ge.s32.totalorder %s656_s15, 1  ;;  %p167_p1 = scmp.lt.s32.totalorder %s656_s15, 3 }
  0x2e   : > { %p168_p3 = pnand %p476_p9, %p167_p1 }
  0x2f   : > { %s782_s5 = sand.u32 (!%p168_p3), 1, %s648_s13  }
  0x30   : > { %171 = sbr.rel (%p168_p3) target bundleno = 92 (0x5c), region = 32  ;;  %s174_s9 = scalar_lea.sflag (!%p168_p3), [#allocation3], %s782_s5 }
  0x31   : > { %s504_s8 = smul.u32 (!%p168_p3), 40, %s782_s5 }
  0x33   : > { %s788_s10 = scalar_lea.vmem (!%p168_p3), [#allocation2], %s504_s8 }
  0x37   : > { %635 = dma.done.wait (%p723_p6), %s174_s9, 640  }
  0x38   : > { %637 = vsyncadd (%p723_p6), %s174_s9, 4294966656  ;;  %s204_s30 = smul.u32 5, %s705_s16  ;;  %vm313_vm0 = vcmask 1040384   ;;  %vm314_vm1 = vsmask.f32 256  ;;  %vm321_vm3 = vcmask 1042432  }
  0x39   : > { %v477_v0 = vld.sshfl [vmem:[%s908_s1] sm:$0x3 pattern:$0x76325410]  ;;  %vm322_vm2 = vsmask.f32 2304  ;;  %vm806_vm4 = vmand %vm313_vm0, %vm314_vm1 }
  0x3a   : > { %p205_p11 = scmp.lt.s32.totalorder %s204_s30, 9  ;;  %v236_v1 = vshrl.u32 %v477_v0, 16  ;;  %v239_v2 = vshll.u32 %v477_v0, 16  ;;  %v555_v4 = vld [vmem:[%s788_s10] sm:$0x3f]   ;;  %vm816_vm5 = vmand %vm321_vm3, %vm322_vm2  ;;  %s833_s22 = scalar_lea.vmem [#allocation5], %s504_s8 }
  0x3b   : > { %v556_v6 = vld [vmem:[%s788_s10 + $0x8] sm:$0x3f]   ;;  %v269_v7 = vshrl.u32 %v555_v4, 16  ;;  %v272_v8 = vshll.u32 %v555_v4, 16  ;;  %v557_v14 = vld [vmem:[%s788_s10 + $0x10] sm:$0x3f]  }
  0x3c   : > { %s928_s30 = smov (!%p205_p11, %s204_s30), 9  ;;  %v238_v5 = vrot.slane %v236_v1, 7  ;;  %v277_v12 = vshrl.u32 %v556_v6, 16  ;;  %v280_v13 = vshll.u32 %v556_v6, 16  ;;  %v558_v22 = vld [vmem:[%s788_s10 + $0x18] sm:$0x3f]  }
  0x3d   : > { %s798_s7 = scalar_lea.vmem %s907_s0, %s928_s30  ;;  %v271_v15 = vrot.slane %v269_v7, 5  ;;  %v274_v16 = vrot.slane %v272_v8, 6  ;;  %v285_v25 = vshrl.u32 %v557_v14, 16  ;;  %v288_v26 = vshll.u32 %v557_v14, 16  ;;  %v559_v30 = vld [vmem:[%s788_s10 + $0x20] sm:$0x3f]  }
  0x3e   : > { %v212_v3 = vld [vmem:[%s798_s7] sm:$0x1]  ;;  %v213_v10 = vld [vmem:[%s798_s7 + $0x1] sm:$0x1]  ;;  %v241_v11 = vor.u32 %v239_v2, %v238_v5  ;;  %v214_v17 = vld [vmem:[%s798_s7 + $0x2] sm:$0x1] }
  0x3f   : > { %v279_v20 = vrot.slane %v277_v12, 5  ;;  %v282_v21 = vrot.slane %v280_v13, 6  ;;  %v275_v23 = vor.u32 %v274_v16, %v271_v15  ;;  %v293_v28 = vshrl.u32 %v558_v22, 16  ;;  %v215_v35 = vld [vmem:[%s798_s7 + $0x3] sm:$0x1]  ;;  %s389_s19 = sshll.u32 %s833_s22, 4  ;;  %s852_s19 = int_to_ptr.vmem [resolvable:$true] %s389_s19 }
  0x40   : > { %v316_v18 = vsel %vm806_vm4, %v212_v3, %v241_v11  ;;  %v317_v24 = vsel %vm806_vm4, %v213_v10, %v241_v11  ;;  %v296_v29 = vshll.u32 %v558_v22, 16  ;;  %v287_v32 = vrot.slane %v285_v25, 5  ;;  %v216_v45 = vld [vmem:[%s798_s7 + $0x4] sm:$0x1]  ;;  %s502_s20 = smul.u32 640, %s705_s16  ;;  %s375_s27 = scalar_lea.sflag [#allocation4], %s782_s5 }
  0x41   : > { %v283_v27 = vor.u32 %v282_v21, %v279_v20  ;;  %v324_v31 = vsel %vm816_vm5, %v316_v18, %v275_v23  ;;  %v290_v33 = vrot.slane %v288_v26, 6  ;;  %v318_v34 = vsel %vm806_vm4, %v214_v17, %v241_v11  ;;  %s590_s28 = scalar_lea.vmem %s852_s19, 640  ;;  %p920_p12 = scmp.ne.s32.totalorder %s913_s23, 0 }
  0x42   : > { %v483_v36 = vcombine.low %v324_v31, %v324_v31  ;;  %v484_v37 = vcombine.high %v324_v31, %v324_v31  ;;  %v295_v39 = vrot.slane %v293_v28, 5  ;;  %v298_v43 = vrot.slane %v296_v29, 6  ;;  %s861_s26 = scalar_lea.hbm %s910_s3, %s502_s20  ;;  %p591_p6 = scmp.ne.s32.totalorder %s852_s19, %s590_s28 }
  0x43   : > { %v325_v38 = vsel %vm816_vm5, %v317_v24, %v283_v27  ;;  %v291_v42 = vor.u32 %v290_v33, %v287_v32  ;;  %v319_v44 = vsel %vm806_vm4, %v215_v35, %v241_v11  ;;  %v301_v46 = vshrl.u32 %v559_v30, 16  ;;  %s661_s29 = smov [#allocation5]  }
  0x44   : > { %v485_v40 = vcombine.low %v325_v38, %v325_v38  ;;  %v486_v41 = vcombine.high %v325_v38, %v325_v38  ;;  %364 = vst [vmem:[%s833_s22] sm:$0xf] %v483_v36  ;;  %365 = vst [vmem:[%s833_s22 + $0x4] sm:$0xf] %v484_v37  ;;  %v304_v47 = vshll.u32 %v559_v30, 16  ;;  %v299_v49 = vor.u32 %v298_v43, %v295_v39  ;;  %p592_p13 = pnand %p591_p6, %p920_p12  ;;  %s594_s8 = sshll.u32 %s661_s29, 4  ;;  %s595_s8 = int_to_ptr.vmem [resolvable:$false] %s594_s8 }
  0x45   : > { %v326_v48 = vsel %vm816_vm5, %v318_v34, %v291_v42  ;;  %v303_v52 = vrot.slane %v301_v46, 5  ;;  %v320_v55 = vsel %vm806_vm4, %v216_v45, %v241_v11  ;;  %s596_s9 = scalar_lea.vmem %s595_s8, 1280  ;;  %p597_p10 = scmp.lt.s32.totalorder %s852_s19, %s595_s8 }
  0x46   : > { %366 = vst [vmem:[%s833_s22 + $0x8] sm:$0xf] %v485_v40  ;;  %367 = vst [vmem:[%s833_s22 + $0xc] sm:$0xf] %v486_v41  ;;  %v487_v50 = vcombine.low %v326_v48, %v326_v48  ;;  %v488_v51 = vcombine.high %v326_v48, %v326_v48  ;;  %v306_v53 = vrot.slane %v304_v47, 6  ;;  %v327_v54 = vsel %vm816_vm5, %v319_v44, %v299_v49  ;;  %p593_p8 = pneg %p592_p13  ;;  %p598_p0 = scmp.lt.s32.totalorder %s596_s9, %s590_s28 }
  0x47   : > { %v489_v56 = vcombine.low %v327_v54, %v327_v54  ;;  %v490_v57 = vcombine.high %v327_v54, %v327_v54 }
  0x48   : > { %368 = vst [vmem:[%s833_s22 + $0x10] sm:$0xf] %v487_v50  ;;  %369 = vst [vmem:[%s833_s22 + $0x14] sm:$0xf] %v488_v51  ;;  %v307_v58 = vor.u32 %v306_v53, %v303_v52  ;;  %p599_p2 = por %p598_p0, %p597_p10 }
  0x49   : > { %370 = vst [vmem:[%s833_s22 + $0x18] sm:$0xf] %v489_v56  ;;  %371 = vst [vmem:[%s833_s22 + $0x1c] sm:$0xf] %v490_v57 }
  0x4a   : > { %v328_v59 = vsel %vm816_vm5, %v320_v55, %v307_v58  ;;  %p600_p4 = pnand %p599_p2, %p593_p8 }
  0x4b   : > { %v491_v60 = vcombine.low %v328_v59, %v328_v59  ;;  %v492_v61 = vcombine.high %v328_v59, %v328_v59 }
  0x4d   : > { %372 = vst [vmem:[%s833_s22 + $0x20] sm:$0xf] %v491_v60  ;;  %373 = vst [vmem:[%s833_s22 + $0x24] sm:$0xf] %v492_v61 }
  0x4e   : > { %603 = shalt.err (!%p600_p4)
}
  0x4f   : > { %s604_s10 = scalar_lea.hbm %s861_s26, 640  ;;  %s608_s6 = scalar_lea.hbm %s910_s3, 1280 }
  0x50   : > { %p605_p5 = scmp.ne.s32.totalorder %s861_s26, %s604_s10  ;;  %p609_p1 = scmp.lt.u32.totalorder %s861_s26, %s910_s3 }
  0x51   : > { %p610_p3 = scmp.lt.u32.totalorder %s608_s6, %s604_s10  ;;  %p612_p6 = scmp.lt.u32.totalorder %s604_s10, %s861_s26 }
  0x52   : > { %p606_p7 = pnand %p605_p5, %p920_p12 }
  0x53   : > { %p611_p11 = por %p610_p3, %p609_p1 }
  0x54   : > { %p607_p9 = pneg %p606_p7 }
  0x55   : > { %p613_p13 = por %p612_p6, %p611_p11 }
  0x57   : > { %p614_p8 = pnand %p613_p13, %p607_p9 }
  0x59   : > { %617 = shalt.err (!%p614_p8)
}
  0x5a   : > { %s662_s17 = smov 64   ;;  %s663_s22 = smov 4  }
  0x5b   : > { %507 = dma.vmem_to_hbm [thread:$0]  (%p920_p12), %s852_s19, 640, %s861_s26, %s375_s27, %s662_s17, %s662_s17, %s663_s22  }
  0x5c PF: > { %s404_s20 = sand.u32 1, %s644_s12   ;;  %p921_p10 = scmp.ne.s32.totalorder %s914_s24, 0 }
  0x5d   : > { %p922_p0 = scmp.ge.s32.totalorder %s656_s15, 2  ;;  %s405_s25 = scalar_lea.sflag [#allocation4], %s404_s20 }
  0x5f   : > { %p514_p2 = pnand %p922_p0, %p921_p10 }
  0x61   : > { %639 = dma.done.wait (!%p514_p2), %s405_s25, 640  }
  0x62   : > { %641 = vsyncadd (!%p514_p2), %s405_s25, 4294966656  ;;  %p16_p4 = scmp.ge.s32.totalorder %s709_s18, 4   ;;  %s923_s12 = smov %s648_s13 }
  0x63   : > { %s924_s13 = smov %s652_s14  ;;  %s925_s14 = smov %s721_s21 }
  0x64   : > { %s926_s15 = smov %s709_s18  ;;  %18 = sbr.rel (!%p16_p4) target bundleno = 5 (0x5), region = 80 }
  0x6b   :  { %410 = vsyncpa [#allocation3], 1 }
  0x6c   :  { %412 = vsyncpa [#allocation3 + $0x1], 1 }
  0x6d   :  { %413 = vsyncpa [#allocation4], 1 }
  0x6e   :  { %415 = vsyncpa [#allocation4 + $0x1], 1 }

</bundles_post_ra>
